<compile_context>
chip_gen: v6e
topology: v6e:2x2x1
jax: 0.10.0
libtpu: 0.0.40
codegen_flags: <defaults>
</compile_context>

<pallas_src>
import jax
import jax.numpy as jnp
from jax.experimental import pallas as pl
from jax.experimental.pallas import tpu as pltpu

N_IN = 784
H1 = 256
H2 = 64
N_OUT = 10
N_OUT_PAD = 128  # lane-dense padded output width (unmasked vst)


def _round_up(n, m):
    return ((n + m - 1) // m) * m


def _sigmoid_f32(x):
    # exp and approx reciprocal both land on the EUP slot (slack vs MXU/DMA).
    return pl.reciprocal(1.0 + jnp.exp(-x), approx=True)


def _mlp_kernel(x_ref, w1_ref, b1_ref, w2_ref, b2_ref, w3_ref, b3_ref, o_ref):
    # x tile: (TB, 784) bf16; weights bf16 in (in, out) layout; biases (1, out) f32.
    x = x_ref[...]

    h1 = jnp.dot(x, w1_ref[...], preferred_element_type=jnp.float32) + b1_ref[...]
    h1 = _sigmoid_f32(h1).astype(jnp.bfloat16)

    h2 = jnp.dot(h1, w2_ref[...], preferred_element_type=jnp.float32) + b2_ref[...]
    h2 = _sigmoid_f32(h2).astype(jnp.bfloat16)

    out = jnp.dot(h2, w3_ref[...], preferred_element_type=jnp.float32) + b3_ref[...]
    o_ref[...] = out.astype(o_ref.dtype)  # bf16 store, lane-dense 128 wide


def prepare_params(params):
    """One-time layout/dtype prep (keep OUT of the per-call forward path).

    PyTorch Linear weights are (out, in); we store (in, out) bf16 so the kernel
    computes y = x @ W + b. fc3 is zero-padded to 128 output lanes.
    """
    w1, b1, w2, b2, w3, b3 = params
    w1_t = w1.T.astype(jnp.bfloat16)                               # (784, 256)
    w2_t = w2.T.astype(jnp.bfloat16)                               # (256, 64)
    w3_t = jnp.zeros((H2, N_OUT_PAD), jnp.bfloat16)
    w3_t = w3_t.at[:, :N_OUT].set(w3.T.astype(jnp.bfloat16))       # (64, 128)
    b1_r = b1.reshape(1, H1).astype(jnp.float32)
    b2_r = b2.reshape(1, H2).astype(jnp.float32)
    b3_r = jnp.zeros((1, N_OUT_PAD), jnp.float32)
    b3_r = b3_r.at[:, :N_OUT].set(b3.astype(jnp.float32))          # (1, 128)
    return (w1_t, b1_r, w2_t, b2_r, w3_t, b3_r)


def _pick_block_b(B):
    if B <= 256:
        # Single small tile; no point splitting tiny batches across cores.
        return _round_up(max(B, 1), 8)
    # >=2 grid steps so v7x's two TensorCores both get work; cap at 2048 to
    # amortize per-step overhead while staying far under VMEM limits.
    return min(2048, _round_up(pl.cdiv(B, 2), 256))


def simple_net_forward(x_nchw, prepared_params, *, block_b=None):
    """x_nchw: (B, 1, 28, 28) float32 or bfloat16. Returns (B, 10) float32."""
    w1_t, b1_r, w2_t, b2_r, w3_t, b3_r = prepared_params
    B = x_nchw.shape[0]

    # flatten(x, 1) and a single bf16 cast (fuses with the reshape under jit).
    # Feeding bf16 end-to-end halves the dominant HBM read stream.
    x = x_nchw.reshape(B, -1)
    if x.dtype != jnp.bfloat16:
        x = x.astype(jnp.bfloat16)

    if block_b is None:
        block_b = _pick_block_b(B)

    # No jnp.pad: ragged last block is handled by Pallas (rows are independent,
    # out-of-range output rows are masked).
    grid = (pl.cdiv(B, block_b),)

    out_padded = pl.pallas_call(
        _mlp_kernel,
        out_shape=jax.ShapeDtypeStruct((B, N_OUT_PAD), jnp.bfloat16),
        grid_spec=pltpu.PrefetchScalarGridSpec(
            num_scalar_prefetch=0,
            grid=grid,
            in_specs=[
                pl.BlockSpec((block_b, N_IN), lambda i: (i, 0)),       # x tile
                pl.BlockSpec((N_IN, H1), lambda i: (0, 0)),            # w1 (resident)
                pl.BlockSpec((1, H1), lambda i: (0, 0)),               # b1
                pl.BlockSpec((H1, H2), lambda i: (0, 0)),              # w2
                pl.BlockSpec((1, H2), lambda i: (0, 0)),               # b2
                pl.BlockSpec((H2, N_OUT_PAD), lambda i: (0, 0)),       # w3 (padded)
                pl.BlockSpec((1, N_OUT_PAD), lambda i: (0, 0)),        # b3 (padded)
            ],
            out_specs=pl.BlockSpec((block_b, N_OUT_PAD), lambda i: (i, 0)),
        ),
        compiler_params=pltpu.CompilerParams(
            dimension_semantics=("parallel",),
            vmem_limit_bytes=48 * 1024 * 1024,
        ),
    )(x, w1_t, b1_r, w2_t, b2_r, w3_t, b3_r)

    # Drop the 118 zero output lanes; return f32 to match the reference module.
    return out_padded[:, :N_OUT].astype(jnp.float32)


def init_params(key):
    """Deterministic init mimicking nn.Linear's uniform(-1/sqrt(in), 1/sqrt(in))."""
    def linear_init(k, out_f, in_f):
        kw, kb = jax.random.split(k)
        bound = 1.0 / jnp.sqrt(jnp.float32(in_f))
        w = jax.random.uniform(kw, (out_f, in_f), jnp.float32, -bound, bound)
        b = jax.random.uniform(kb, (out_f,), jnp.float32, -bound, bound)
        return w, b

    k1, k2, k3 = jax.random.split(key, 3)
    w1, b1 = linear_init(k1, 256, 784)
    w2, b2 = linear_init(k2, 64, 256)
    w3, b3 = linear_init(k3, 10, 64)
    return (w1, b1, w2, b2, w3, b3)


if __name__ == "__main__":
    key = jax.random.PRNGKey(0)
    k_params, k_x = jax.random.split(key)

    params = init_params(k_params)
    prepared = prepare_params(params)   # transpose / pad / bf16-cast once

    # Small MNIST-like batch: (B=2, C=1, H=28, W=28) -> flatten to 784 features.
    x = jax.random.normal(k_x, (2, 1, 28, 28), dtype=jnp.float32)

    fwd = jax.jit(simple_net_forward)   # fuses the bf16 cast / reshape / slice
    out = fwd(x, prepared)
    out = jax.block_until_ready(out)

    # Sanity check against a pure-JAX f32 reference (kernel uses bf16 MXU
    # inputs + bf16 output with f32 accumulation -> loosened tolerance).
    w1, b1, w2, b2, w3, b3 = params
    xf = x.reshape(x.shape[0], -1)
    ref = jax.nn.sigmoid(xf @ w1.T + b1)
    ref = jax.nn.sigmoid(ref @ w2.T + b2)
    ref = ref @ w3.T + b3

    assert out.shape == (2, 10)
    assert out.dtype == jnp.float32
    assert jnp.allclose(out, ref, atol=2e-2, rtol=2e-2), (
        f"max abs err = {jnp.max(jnp.abs(out - ref))}")

    print("KERNEL_OK")
</pallas_src>

<mosaic_0001>
module attributes {stable_mosaic.version = 11 : i64} {
  func.func @_mlp_kernel(%arg0: i32, %arg1: memref<8x784xbf16, #tpu.memory_space<vmem>>, %arg2: memref<784x256xbf16, #tpu.memory_space<vmem>>, %arg3: memref<1x256xf32, #tpu.memory_space<vmem>>, %arg4: memref<256x64xbf16, #tpu.memory_space<vmem>>, %arg5: memref<1x64xf32, #tpu.memory_space<vmem>>, %arg6: memref<64x128xbf16, #tpu.memory_space<vmem>>, %arg7: memref<1x128xf32, #tpu.memory_space<vmem>>, %arg8: memref<8x128xbf16, #tpu.memory_space<vmem>>) attributes {dimension_semantics = [#tpu.dimension_semantics<parallel>], iteration_bounds = array<i64: 1>, scalar_prefetch = 0 : i64, scratch_operands = 0 : i64, tpu.core_type = #tpu.core_type<tc>, window_params = [{transform_indices = @transform_0, window_bounds = array<i64: 8, 784>}, {pipeline_mode = #tpu.pipeline_mode<synchronous>, transform_indices = @transform_1, window_bounds = array<i64: 784, 256>}, {pipeline_mode = #tpu.pipeline_mode<synchronous>, transform_indices = @transform_2, window_bounds = array<i64: 1, 256>}, {pipeline_mode = #tpu.pipeline_mode<synchronous>, transform_indices = @transform_3, window_bounds = array<i64: 256, 64>}, {pipeline_mode = #tpu.pipeline_mode<synchronous>, transform_indices = @transform_4, window_bounds = array<i64: 1, 64>}, {pipeline_mode = #tpu.pipeline_mode<synchronous>, transform_indices = @transform_5, window_bounds = array<i64: 64, 128>}, {pipeline_mode = #tpu.pipeline_mode<synchronous>, transform_indices = @transform_6, window_bounds = array<i64: 1, 128>}, {transform_indices = @transform_7, window_bounds = array<i64: 8, 128>}]} {
    %c0 = arith.constant 0 : index
    %c0_0 = arith.constant 0 : index
    %0 = vector.load %arg1[%c0, %c0_0] : memref<8x784xbf16, #tpu.memory_space<vmem>>, vector<8x784xbf16>
    %c0_1 = arith.constant 0 : index
    %c0_2 = arith.constant 0 : index
    %1 = vector.load %arg2[%c0_1, %c0_2] : memref<784x256xbf16, #tpu.memory_space<vmem>>, vector<784x256xbf16>
    %cst = arith.constant dense<0.000000e+00> : vector<8x256xf32>
    %2 = tpu.matmul %0, %1, %cst {dimension_numbers = #tpu.dot_dimension_numbers<[1], [0], [0], [1], [0, 0, 1, 1], [], []>} : vector<8x784xbf16>, vector<784x256xbf16>, vector<8x256xf32> -> vector<8x256xf32>
    %c0_3 = arith.constant 0 : index
    %c0_4 = arith.constant 0 : index
    %3 = vector.load %arg3[%c0_3, %c0_4] : memref<1x256xf32, #tpu.memory_space<vmem>>, vector<1x256xf32>
    %4 = vector.broadcast %3 : vector<1x256xf32> to vector<8x256xf32>
    %5 = arith.addf %2, %4 : vector<8x256xf32>
    %cst_5 = arith.constant 0.000000e+00 : f32
    %6 = vector.broadcast %cst_5 : f32 to vector<8x256xf32>
    %7 = arith.subf %6, %5 : vector<8x256xf32>
    %8 = math.exp %7 : vector<8x256xf32>
    %cst_6 = arith.constant 1.000000e+00 : f32
    %9 = vector.broadcast %cst_6 : f32 to vector<8x256xf32>
    %10 = arith.addf %9, %8 : vector<8x256xf32>
    %11 = tpu.reciprocal %10 {approx = true} : vector<8x256xf32> -> vector<8x256xf32>
    %12 = arith.truncf %11 : vector<8x256xf32> to vector<8x256xbf16>
    %c0_7 = arith.constant 0 : index
    %c0_8 = arith.constant 0 : index
    %13 = vector.load %arg4[%c0_7, %c0_8] : memref<256x64xbf16, #tpu.memory_space<vmem>>, vector<256x64xbf16>
    %cst_9 = arith.constant dense<0.000000e+00> : vector<8x64xf32>
    %14 = tpu.matmul %12, %13, %cst_9 {dimension_numbers = #tpu.dot_dimension_numbers<[1], [0], [0], [1], [0, 0, 1, 1], [], []>} : vector<8x256xbf16>, vector<256x64xbf16>, vector<8x64xf32> -> vector<8x64xf32>
    %c0_10 = arith.constant 0 : index
    %c0_11 = arith.constant 0 : index
    %15 = vector.load %arg5[%c0_10, %c0_11] : memref<1x64xf32, #tpu.memory_space<vmem>>, vector<1x64xf32>
    %16 = vector.broadcast %15 : vector<1x64xf32> to vector<8x64xf32>
    %17 = arith.addf %14, %16 : vector<8x64xf32>
    %cst_12 = arith.constant 0.000000e+00 : f32
    %18 = vector.broadcast %cst_12 : f32 to vector<8x64xf32>
    %19 = arith.subf %18, %17 : vector<8x64xf32>
    %20 = math.exp %19 : vector<8x64xf32>
    %cst_13 = arith.constant 1.000000e+00 : f32
    %21 = vector.broadcast %cst_13 : f32 to vector<8x64xf32>
    %22 = arith.addf %21, %20 : vector<8x64xf32>
    %23 = tpu.reciprocal %22 {approx = true} : vector<8x64xf32> -> vector<8x64xf32>
    %24 = arith.truncf %23 : vector<8x64xf32> to vector<8x64xbf16>
    %c0_14 = arith.constant 0 : index
    %c0_15 = arith.constant 0 : index
    %25 = vector.load %arg6[%c0_14, %c0_15] : memref<64x128xbf16, #tpu.memory_space<vmem>>, vector<64x128xbf16>
    %cst_16 = arith.constant dense<0.000000e+00> : vector<8x128xf32>
    %26 = tpu.matmul %24, %25, %cst_16 {dimension_numbers = #tpu.dot_dimension_numbers<[1], [0], [0], [1], [0, 0, 1, 1], [], []>} : vector<8x64xbf16>, vector<64x128xbf16>, vector<8x128xf32> -> vector<8x128xf32>
    %c0_17 = arith.constant 0 : index
    %c0_18 = arith.constant 0 : index
    %27 = vector.load %arg7[%c0_17, %c0_18] : memref<1x128xf32, #tpu.memory_space<vmem>>, vector<1x128xf32>
    %28 = vector.broadcast %27 : vector<1x128xf32> to vector<8x128xf32>
    %29 = arith.addf %26, %28 : vector<8x128xf32>
    %30 = arith.truncf %29 : vector<8x128xf32> to vector<8x128xbf16>
    %c0_19 = arith.constant 0 : index
    %c0_20 = arith.constant 0 : index
    %31 = vector.load %arg8[%c0_19, %c0_20] : memref<8x128xbf16, #tpu.memory_space<vmem>>, vector<8x128xbf16>
    tpu.vector_store %arg8[%c0_19, %c0_20], %30 {strides = array<i32>} : memref<8x128xbf16, #tpu.memory_space<vmem>>, vector<8x128xbf16>,
    return
  }
  func.func @transform_0(%arg0: i32) -> (i32, i32) {
    %c0_i32 = arith.constant 0 : i32
    %c0_i32_0 = arith.constant 0 : i32
    return %arg0, %c0_i32 : i32, i32
  }
  func.func @transform_1(%arg0: i32) -> (i32, i32) {
    %c0_i32 = arith.constant 0 : i32
    %c0_i32_0 = arith.constant 0 : i32
    %c0_i32_1 = arith.constant 0 : i32
    return %c0_i32, %c0_i32_0 : i32, i32
  }
  func.func @transform_2(%arg0: i32) -> (i32, i32) {
    %c0_i32 = arith.constant 0 : i32
    %c0_i32_0 = arith.constant 0 : i32
    %c0_i32_1 = arith.constant 0 : i32
    return %c0_i32, %c0_i32_0 : i32, i32
  }
  func.func @transform_3(%arg0: i32) -> (i32, i32) {
    %c0_i32 = arith.constant 0 : i32
    %c0_i32_0 = arith.constant 0 : i32
    %c0_i32_1 = arith.constant 0 : i32
    return %c0_i32, %c0_i32_0 : i32, i32
  }
  func.func @transform_4(%arg0: i32) -> (i32, i32) {
    %c0_i32 = arith.constant 0 : i32
    %c0_i32_0 = arith.constant 0 : i32
    %c0_i32_1 = arith.constant 0 : i32
    return %c0_i32, %c0_i32_0 : i32, i32
  }
  func.func @transform_5(%arg0: i32) -> (i32, i32) {
    %c0_i32 = arith.constant 0 : i32
    %c0_i32_0 = arith.constant 0 : i32
    %c0_i32_1 = arith.constant 0 : i32
    return %c0_i32, %c0_i32_0 : i32, i32
  }
  func.func @transform_6(%arg0: i32) -> (i32, i32) {
    %c0_i32 = arith.constant 0 : i32
    %c0_i32_0 = arith.constant 0 : i32
    %c0_i32_1 = arith.constant 0 : i32
    return %c0_i32, %c0_i32_0 : i32, i32
  }
  func.func @transform_7(%arg0: i32) -> (i32, i32) {
    %c0_i32 = arith.constant 0 : i32
    %c0_i32_0 = arith.constant 0 : i32
    return %arg0, %c0_i32 : i32, i32
  }
}

</mosaic_0001>

<bundles_post_ra>
// kernel: simple_net_forward.1
= control target key start
LH: loop header
LB: loop body
LE: loop exit
PB: predicated region body
PF: predicated region fallthrough
CT: control target
= control target key end

     0   :  { %12 = vsyncpa [#allocation3], 0  ;;  %s1619_s24 = smov [#allocation2]   ;;  %s1770_s0 = inlined_call_operand.vmem [shape: bf16[2,784], index: 0, kind: input, shape index: {}]   ;;  %s1771_s1 = inlined_call_operand.hbm [shape: bf16[784,256], index: 1, kind: input, shape index: {}]   ;;  %s1772_s2 = inlined_call_operand.vmem [shape: f32[1,256], index: 2, kind: input, shape index: {}]   ;;  %s1773_s3 = inlined_call_operand.vmem [shape: bf16[256,64], index: 3, kind: input, shape index: {}]   ;;  %s1774_s4 = inlined_call_operand.vmem [shape: f32[1,64], index: 4, kind: input, shape index: {}]   ;;  %s1775_s5 = inlined_call_operand.vmem [shape: bf16[64,128], index: 5, kind: input, shape index: {}]   ;;  %s1776_s6 = inlined_call_operand.vmem [shape: f32[1,128], index: 6, kind: input, shape index: {}]   ;;  %s1777_s7 = inlined_call_operand.vmem [shape: bf16[2,128], index: 7, kind: output, shape index: {}]  }
   0x1   :  { %s20_s25 = sshll.u32 %s1619_s24, 4  ;;  %s21_s25 = int_to_ptr.vmem [resolvable:$true] %s20_s25 }
   0x2   :  { %s1605_s26 = scalar_lea.vmem %s21_s25, 12544  ;;  %p1610_p1 = scmp.lt.s32.totalorder %s21_s25, %s21_s25 }
   0x3   :  { %p1606_p0 = scmp.ne.s32.totalorder %s21_s25, %s1605_s26  ;;  %p1611_p2 = scmp.lt.s32.totalorder %s1605_s26, %s1605_s26 }
   0x5   :  { %p1612_p3 = por %p1611_p2, %p1610_p1 }
   0x7   :  { %p1613_p4 = pnand %p1612_p3, %p1606_p0 }
   0x9   :  { %1616 = shalt.err (!%p1613_p4)
}
   0xa   :  { %s1620_s27 = smov 128   ;;  %s1621_s28 = smov 8  }
   0xb   :  { %26 = dma.hbm_to_vmem [thread:$0]  %s1771_s1, 12544, %s21_s25, [#allocation3], %s1620_s27, %s1620_s27, %s1621_s28  }
   0xc   :  { %1617 = dma.done.wait [#allocation3], 12544  }
   0xd   :  { %1618 = vsyncadd [#allocation3], 4294954752  ;;  %v1412_v0 = vld [vmem:[#allocation2 + $0x74] ss:$8 sps:$4 sm:$0xff]   ;;  %v1414_v1 = vld [vmem:[#allocation2 + $0x70] ss:$8 sps:$4 sm:$0xff]   ;;  %v145_v37 = vlaneseq }
   0xe   :  { %726 = vmatprep.subr.bf16.mxu0 %v1412_v0  ;;  %v1415_v2 = vld [vmem:[#allocation2 + $0x174] ss:$8 sps:$4 sm:$0xff]   ;;  %v1417_v3 = vld [vmem:[#allocation2 + $0x170] ss:$8 sps:$4 sm:$0xff]   ;;  %v1418_v4 = vld [vmem:[#allocation2 + $0x64] ss:$8 sps:$4 sm:$0xff]  }
   0xf   :  { %727 = vmatpush1.bf16.msra.mxu0 %v1414_v1  ;;  %v1420_v5 = vld [vmem:[#allocation2 + $0x60] ss:$8 sps:$4 sm:$0xff]   ;;  %767 = vmatprep.subr.bf16.mxu1 %v1415_v2  ;;  %v1421_v6 = vld [vmem:[#allocation2 + $0x164] ss:$8 sps:$4 sm:$0xff]   ;;  %v1424_v8 = vld [vmem:[#allocation2 + $0x54] ss:$8 sps:$4 sm:$0xff]  }
  0x10   :  { %768 = vmatpush1.bf16.msra.mxu1 %v1417_v3  ;;  %728 = vmatprep.subr.bf16.mxu0 %v1418_v4  ;;  %v1423_v7 = vld [vmem:[#allocation2 + $0x160] ss:$8 sps:$4 sm:$0xff]   ;;  %v1426_v9 = vld [vmem:[#allocation2 + $0x50] ss:$8 sps:$4 sm:$0xff]   ;;  %v1427_v10 = vld [vmem:[#allocation2 + $0x154] ss:$8 sps:$4 sm:$0xff]  }
  0x11   :  { %769 = vmatprep.subr.bf16.mxu1 %v1421_v6  ;;  %v1430_v11 = vld [vmem:[#allocation2 + $0x44] ss:$8 sps:$4 sm:$0xff]   ;;  %v1429_v12 = vld [vmem:[#allocation2 + $0x150] ss:$8 sps:$4 sm:$0xff]   ;;  %v1432_v14 = vld [vmem:[#allocation2 + $0x40] ss:$8 sps:$4 sm:$0xff]  }
  0x12   :  { %v1433_v13 = vld [vmem:[#allocation2 + $0x144] ss:$8 sps:$4 sm:$0xff]   ;;  %v1436_v15 = vld [vmem:[#allocation2 + $0x34] ss:$8 sps:$4 sm:$0xff]   ;;  %v1435_v16 = vld [vmem:[#allocation2 + $0x140] ss:$8 sps:$4 sm:$0xff]  }
  0x13   :  { %729 = vmatpush1.bf16.msra.mxu0 %v1420_v5  ;;  %v1439_v17 = vld [vmem:[#allocation2 + $0x134] ss:$8 sps:$4 sm:$0xff]   ;;  %v1438_v18 = vld [vmem:[#allocation2 + $0x30] ss:$8 sps:$4 sm:$0xff]   ;;  %v1442_v19 = vld [vmem:[#allocation2 + $0x24] ss:$8 sps:$4 sm:$0xff]  }
  0x14   :  { %730 = vmatprep.subr.bf16.mxu0 %v1424_v8  ;;  %770 = vmatpush1.bf16.msra.mxu1 %v1423_v7  ;;  %v1441_v20 = vld [vmem:[#allocation2 + $0x130] ss:$8 sps:$4 sm:$0xff]   ;;  %v1445_v21 = vld [vmem:[#allocation2 + $0x124] ss:$8 sps:$4 sm:$0xff]   ;;  %v1444_v22 = vld [vmem:[#allocation2 + $0x20] ss:$8 sps:$4 sm:$0xff]  }
  0x15   :  { %771 = vmatprep.subr.bf16.mxu1 %v1427_v10  ;;  %v1448_v23 = vld [vmem:[#allocation2 + $0x14] ss:$8 sps:$4 sm:$0xff]   ;;  %v1447_v24 = vld [vmem:[#allocation2 + $0x120] ss:$8 sps:$4 sm:$0xff]   ;;  %v1450_v26 = vld [vmem:[#allocation2 + $0x10] ss:$8 sps:$4 sm:$0xff]  }
  0x16   :  { %v1451_v25 = vld [vmem:[#allocation2 + $0x114] ss:$8 sps:$4 sm:$0xff]   ;;  %v1454_v27 = vld [vmem:[#allocation2 + $0x4] ss:$8 sps:$4 sm:$0xff]   ;;  %v1453_v28 = vld [vmem:[#allocation2 + $0x110] ss:$8 sps:$4 sm:$0xff]  }
  0x17   :  { %731 = vmatpush1.bf16.msra.mxu0 %v1426_v9  ;;  %v1457_v29 = vld [vmem:[#allocation2 + $0x104] ss:$8 sps:$4 sm:$0xff]   ;;  %v1456_v30 = vld [vmem:[#allocation2] ss:$8 sps:$4 sm:$0xff]   ;;  %v1460_v31 = vld [vmem:[#allocation2 + $0xf4] ss:$8 sps:$4 sm:$0xff]  }
  0x18   :  { %732 = vmatprep.subr.bf16.mxu0 %v1430_v11  ;;  %772 = vmatpush1.bf16.msra.mxu1 %v1429_v12  ;;  %v1459_v32 = vld [vmem:[#allocation2 + $0x100] ss:$8 sps:$4 sm:$0xff]   ;;  %v1463_v33 = vld [vmem:[#allocation2 + $0x1f4] ss:$8 sps:$4 sm:$0xff]   ;;  %v1462_v34 = vld [vmem:[#allocation2 + $0xf0] ss:$8 sps:$4 sm:$0xff]  }
  0x19   :  { %773 = vmatprep.subr.bf16.mxu1 %v1433_v13  ;;  %v1466_v35 = vld [vmem:[#allocation2 + $0xe4] ss:$8 sps:$4 sm:$0xff]   ;;  %v1465_v36 = vld [vmem:[#allocation2 + $0x1f0] ss:$8 sps:$4 sm:$0xff]   ;;  %v1622_v38 = vmov 1966171168  }
  0x1a   :  { %v164_v39 = vunpack.c.l.s4 %v1622_v38  ;;  %v1469_v40 = vld [vmem:[#allocation2 + $0x1e4] ss:$8 sps:$4 sm:$0xff]   ;;  %v1468_v41 = vld [vmem:[#allocation2 + $0xe0] ss:$8 sps:$4 sm:$0xff]   ;;  %v1472_v42 = vld [vmem:[#allocation2 + $0xd4] ss:$8 sps:$4 sm:$0xff]  }
  0x1b   :  { %733 = vmatpush1.bf16.msra.mxu0 %v1432_v14  ;;  %v1471_v43 = vld [vmem:[#allocation2 + $0x1e0] ss:$8 sps:$4 sm:$0xff]   ;;  %v1669_v44 = vshrl.u32 %v145_v37, 7  ;;  %v1475_v46 = vld [vmem:[#allocation2 + $0x1d4] ss:$8 sps:$4 sm:$0xff]   ;;  %vm722_vm0 = vcmask 130048  }
  0x1c   :  { %734 = vmatprep.subr.bf16.mxu0 %v1436_v15  ;;  %774 = vmatpush1.bf16.msra.mxu1 %v1435_v16  ;;  %v165_v45 = vunpack.c.0.s8 %v164_v39  ;;  %v1474_v47 = vld [vmem:[#allocation2 + $0xd0] ss:$8 sps:$4 sm:$0xff]   ;;  %v1478_v49 = vld [vmem:[#allocation2 + $0xc4] ss:$8 sps:$4 sm:$0xff]   ;;  %v1480_v50 = vld [vmem:[#allocation2 + $0xc0] ss:$8 sps:$4 sm:$0xff]  }
  0x1d   :  { %775 = vmatprep.subr.bf16.mxu1 %v1439_v17  ;;  %v1477_v48 = vld [vmem:[#allocation2 + $0x1d0] ss:$8 sps:$4 sm:$0xff]   ;;  %v1481_v52 = vld [vmem:[#allocation2 + $0x1c4] ss:$8 sps:$4 sm:$0xff]   ;;  %v1484_v54 = vld [vmem:[#allocation2 + $0xb4] ss:$8 sps:$4 sm:$0xff]  }
  0x1e   :  { %v1672_v51 = vsub.s32 %v165_v45, %v1669_v44  ;;  %v1507_v53 = vld [vmem:[%s1770_s0] ss:$7 sps:$4 sm:$0xff]   ;;  %v1510_v55 = vld [vmem:[%s1770_s0 + $0xe] ss:$7 sps:$4 sm:$0xff]   ;;  %vm1625_vm1 = vmmov 0   ;;  %vm1122_vm2 = vcmask 523264  }
  0x1f   :  { %735 = vmatpush1.bf16.msra.mxu0 %v1438_v18  ;;  %v1483_v56 = vld [vmem:[#allocation2 + $0x1c0] ss:$8 sps:$4 sm:$0xff]   ;;  %v1487_v58 = vld [vmem:[#allocation2 + $0x1b4] ss:$8 sps:$4 sm:$0xff]   ;;  %v1486_v60 = vld [vmem:[#allocation2 + $0xb0] ss:$8 sps:$4 sm:$0xff]  }
  0x20   :  { %736 = vmatprep.subr.bf16.mxu0 %v1442_v19  ;;  %776 = vmatpush1.bf16.msra.mxu1 %v1441_v20  ;;  %v169_v57 = vrot.slane %v1507_v53, %v1672_v51  ;;  %v183_v59 = vrot.slane %v1510_v55, %v1672_v51  ;;  %v1490_v61 = vld [vmem:[#allocation2 + $0xa4] ss:$8 sps:$4 sm:$0xff]   ;;  %v1489_v63 = vld [vmem:[#allocation2 + $0x1b0] ss:$8 sps:$4 sm:$0xff]   ;;  %v1492_v0 = vld [vmem:[#allocation2 + $0xa0] ss:$8 sps:$4 sm:$0xff]  }
  0x21   :  { %777 = vmatprep.subr.bf16.mxu1 %v1445_v21  ;;  %v1493_v1 = vld [vmem:[#allocation2 + $0x1a4] ss:$8 sps:$4 sm:$0xff]   ;;  %v1495_v3 = vld [vmem:[#allocation2 + $0x1a0] ss:$8 sps:$4 sm:$0xff]   ;;  %v1496_v4 = vld [vmem:[#allocation2 + $0x94] ss:$8 sps:$4 sm:$0xff]  }
  0x22   :  { %v192_v62 = vcombine.high %v169_v57, %v183_v59  ;;  %v1509_v5 = vld [vmem:[%s1770_s0 + $0x4] ss:$7 sps:$4 sm:$0x77]   ;;  %v1512_v7 = vld [vmem:[%s1770_s0 + $0x12] ss:$7 sps:$4 sm:$0x77]   ;;  %v191_v11 = vcombine.low %v169_v57, %v183_v59 }
  0x23   :  { %737 = vmatpush1.bf16.msra.mxu0 %v1444_v22  ;;  %v1499_v8 = vld [vmem:[#allocation2 + $0x194] ss:$8 sps:$4 sm:$0xff]   ;;  %v1498_v9 = vld [vmem:[#allocation2 + $0x90] ss:$8 sps:$4 sm:$0xff]   ;;  %v1502_v10 = vld [vmem:[#allocation2 + $0x84] ss:$8 sps:$4 sm:$0xff]   ;;  %v176_v13 = vrot.slane %v1509_v5, %v1672_v51  ;;  %v190_v14 = vrot.slane %v1512_v7, %v1672_v51 }
  0x24   :  { %738 = vmatprep.subr.bf16.mxu0 %v1448_v23  ;;  %778 = vmatpush1.bf16.msra.mxu1 %v1447_v24  ;;  %v215_v2 = vrot.slane %v192_v62, %v1672_v51  ;;  %v1501_v12 = vld [vmem:[#allocation2 + $0x190] ss:$8 sps:$4 sm:$0xff]   ;;  %v1505_v15 = vld [vmem:[#allocation2 + $0x184] ss:$8 sps:$4 sm:$0xff]   ;;  %v1504_v16 = vld [vmem:[#allocation2 + $0x80] ss:$8 sps:$4 sm:$0xff]   ;;  %v201_v18 = vrot.slane %v191_v11, %v1672_v51 }
  0x25   :  { %779 = vmatprep.subr.bf16.mxu1 %v1451_v25  ;;  %v194_v17 = vcombine.high %v176_v13, %v190_v14  ;;  %v1516_v19 = vld [vmem:[#allocation2 + $0x274] ss:$8 sps:$4 sm:$0xff]   ;;  %v1513_v20 = vld [vmem:[#allocation2 + $0x180] ss:$8 sps:$4 sm:$0xff]   ;;  %v1514_v21 = vld [vmem:[#allocation2 + $0x270] ss:$8 sps:$4 sm:$0xff]   ;;  %v193_v23 = vcombine.low %v176_v13, %v190_v14 }
  0x26   :  { %758 = vmatprep.mubr.bf16.mxu0 %v215_v2  ;;  %v225_v6 = vcombine.high %v215_v2, %v215_v2  ;;  %v223_v24 = vcombine.high %v201_v18, %v201_v18  ;;  %v1519_v25 = vld [vmem:[#allocation2 + $0x264] ss:$8 sps:$4 sm:$0xff]   ;;  %v1526_v37 = vld [vmem:[#allocation2 + $0x230] ss:$8 sps:$4 sm:$0xff]   ;;  %v1529_v39 = vld [vmem:[#allocation2 + $0x220] ss:$8 sps:$4 sm:$0xff]  }
  0x27   :  { %739 = vmatpush1.bf16.msra.mxu0 %v1450_v26  ;;  %v222_v22 = vrot.slane %v194_v17, %v1672_v51  ;;  %v1559_v26 = vld [vmem:[#allocation2 + $0x300] ss:$8 sps:$4 sm:$0xff]   ;;  %v1531_v38 = vld [vmem:[#allocation2 + $0x224] ss:$8 sps:$4 sm:$0xff]   ;;  %v1540_v45 = vld [vmem:[#allocation2 + $0x2f4] ss:$8 sps:$4 sm:$0xff]  }
  0x28   :  { %740 = vmatprep.subr.bf16.mxu0 %v1454_v27  ;;  %780 = vmatpush1.bf16.msra.mxu1 %v1453_v28  ;;  %v1561_v27 = vld [vmem:[#allocation2 + $0x304] ss:$8 sps:$4 sm:$0xff]   ;;  %v1517_v28 = vld [vmem:[#allocation2 + $0x260] ss:$8 sps:$4 sm:$0xff]   ;;  %v1550_v55 = vld [vmem:[#allocation2 + $0x2b0] ss:$8 sps:$4 sm:$0xff]  }
  0x29   :  { %781 = vmatprep.subr.bf16.mxu1 %v1457_v29  ;;  %799 = vmatprep.mubr.bf16.mxu1 %v225_v6  ;;  %v1522_v29 = vld [vmem:[#allocation2 + $0x254] ss:$8 sps:$4 sm:$0xff]   ;;  %v1547_v53 = vld [vmem:[#allocation2 + $0x2c0] ss:$8 sps:$4 sm:$0xff]   ;;  %v1556_v59 = vld [vmem:[#allocation2 + $0x290] ss:$8 sps:$4 sm:$0xff]  }
  0x2a   :  { %v1553_v57 = vld [vmem:[#allocation2 + $0x2a0] ss:$8 sps:$4 sm:$0xff]   ;;  %v1565_v62 = vld [vmem:[%s1773_s3 + $0x78] sm:$0xff]  }
  0x2b   :  { %741 = vmatpush1.bf16.msra.mxu0 %v1456_v30  ;;  %v208_v30 = vrot.slane %v193_v23, %v1672_v51  ;;  %v1569_v2 = vld [vmem:[%s1773_s3 + $0x68] sm:$0xff]   ;;  %v1572_v5 = vld [vmem:[%s1773_s3 + $0x20] sm:$0xff]   ;;  %v1573_v6 = vld [vmem:[%s1773_s3 + $0x58] sm:$0xff]  }
  0x2c   :  { %742 = vmatprep.subr.bf16.mxu0 %v1460_v31  ;;  %782 = vmatpush1.bf16.msra.mxu1 %v1459_v32  ;;  %v1520_v31 = vld [vmem:[#allocation2 + $0x250] ss:$8 sps:$4 sm:$0xff]   ;;  %v1623_v32 = vmov 0   ;;  %v1578_v11 = vld [vmem:[%s1773_s3 + $0x8] sm:$0xff]   ;;  %v1580_v13 = vld [vmem:[%s1773_s3] sm:$0xff]  }
  0x2d   :  { %783 = vmatprep.subr.bf16.mxu1 %v1463_v33  ;;  %v1525_v33 = vld [vmem:[#allocation2 + $0x244] ss:$8 sps:$4 sm:$0xff]   ;;  %v1574_v7 = vld [vmem:[%s1773_s3 + $0x18] sm:$0xff]  }
  0x2f   :  { %743 = vmatpush2.bf16.msra.mxu0 %v1462_v34  ;;  %v224_v34 = vcombine.high %v208_v30, %v208_v30 }
  0x30   :  { %744 = vmatprep.subr.bf16.mxu0 %v1466_v35  ;;  %784 = vmatpush2.bf16.msra.mxu1 %v1465_v36  ;;  %v1523_v35 = vld [vmem:[#allocation2 + $0x240] ss:$8 sps:$4 sm:$0xff]   ;;  %v1528_v36 = vld [vmem:[#allocation2 + $0x234] ss:$8 sps:$4 sm:$0xff]  }
  0x31   :  { %785 = vmatprep.subr.bf16.mxu1 %v1469_v40  ;;  %v1534_v40 = vld [vmem:[#allocation2 + $0x214] ss:$8 sps:$4 sm:$0xff]  }
  0x33   :  { %745 = vmatpush2.bf16.msra.mxu0 %v1468_v41  ;;  %v1532_v41 = vld [vmem:[#allocation2 + $0x210] ss:$8 sps:$4 sm:$0xff]  }
  0x34   :  { %746 = vmatprep.subr.bf16.mxu0 %v1472_v42  ;;  %786 = vmatpush2.bf16.msra.mxu1 %v1471_v43  ;;  %v1537_v42 = vld [vmem:[#allocation2 + $0x204] ss:$8 sps:$4 sm:$0xff]   ;;  %v1535_v43 = vld [vmem:[#allocation2 + $0x200] ss:$8 sps:$4 sm:$0xff]  }
  0x35   :  { %787 = vmatprep.subr.bf16.mxu1 %v1475_v46  ;;  %v1538_v46 = vld [vmem:[#allocation2 + $0x2f0] ss:$8 sps:$4 sm:$0xff]  }
  0x37   :  { %747 = vmatpush2.bf16.msra.mxu0 %v1474_v47  ;;  %v1543_v47 = vld [vmem:[#allocation2 + $0x2e4] ss:$8 sps:$4 sm:$0xff]  }
  0x38   :  { %748 = vmatprep.subr.bf16.mxu0 %v1478_v49  ;;  %788 = vmatpush2.bf16.msra.mxu1 %v1477_v48  ;;  %v1541_v48 = vld [vmem:[#allocation2 + $0x2e0] ss:$8 sps:$4 sm:$0xff]   ;;  %v1546_v49 = vld [vmem:[#allocation2 + $0x2d4] ss:$8 sps:$4 sm:$0xff]  }
  0x39   :  { %789 = vmatprep.subr.bf16.mxu1 %v1481_v52  ;;  %v1549_v52 = vld [vmem:[#allocation2 + $0x2c4] ss:$8 sps:$4 sm:$0xff]  }
  0x3b   :  { %749 = vmatpush2.bf16.msra.mxu0 %v1480_v50  ;;  %v1544_v50 = vld [vmem:[#allocation2 + $0x2d0] ss:$8 sps:$4 sm:$0xff]  }
  0x3c   :  { %750 = vmatprep.subr.bf16.mxu0 %v1484_v54  ;;  %790 = vmatpush2.bf16.msra.mxu1 %v1483_v56  ;;  %v1552_v54 = vld [vmem:[#allocation2 + $0x2b4] ss:$8 sps:$4 sm:$0xff]   ;;  %v1555_v56 = vld [vmem:[#allocation2 + $0x2a4] ss:$8 sps:$4 sm:$0xff]  }
  0x3d   :  { %791 = vmatprep.subr.bf16.mxu1 %v1487_v58  ;;  %v1558_v58 = vld [vmem:[#allocation2 + $0x294] ss:$8 sps:$4 sm:$0xff]  }
  0x3f   :  { %751 = vmatpush2.bf16.msra.mxu0 %v1486_v60  ;;  %v1564_v60 = vld [vmem:[#allocation2 + $0x284] ss:$8 sps:$4 sm:$0xff]  }
  0x40   :  { %752 = vmatprep.subr.bf16.mxu0 %v1490_v61  ;;  %792 = vmatpush2.bf16.msra.mxu1 %v1489_v63  ;;  %v1562_v61 = vld [vmem:[#allocation2 + $0x280] ss:$8 sps:$4 sm:$0xff]   ;;  %v1566_v63 = vld [vmem:[%s1773_s3 + $0x38] sm:$0xff]  }
  0x41   :  { %793 = vmatprep.subr.bf16.mxu1 %v1493_v1  ;;  %v1568_v1 = vld [vmem:[%s1773_s3 + $0x30] sm:$0xff]  }
  0x43   :  { %753 = vmatpush2.bf16.msra.mxu0 %v1492_v0  ;;  %v1567_v0 = vld [vmem:[%s1773_s3 + $0x70] sm:$0xff]  }
  0x44   :  { %754 = vmatprep.subr.bf16.mxu0 %v1496_v4  ;;  %794 = vmatpush2.bf16.msra.mxu1 %v1495_v3  ;;  %v1570_v3 = vld [vmem:[%s1773_s3 + $0x28] sm:$0xff]   ;;  %v1571_v4 = vld [vmem:[%s1773_s3 + $0x60] sm:$0xff]  }
  0x45   :  { %795 = vmatprep.subr.bf16.mxu1 %v1499_v8  ;;  %v1575_v8 = vld [vmem:[%s1773_s3 + $0x50] sm:$0xff]  }
  0x47   :  { %755 = vmatpush2.bf16.msra.mxu0 %v1498_v9  ;;  %v1576_v9 = vld [vmem:[%s1773_s3 + $0x10] sm:$0xff]  }
  0x48   :  { %756 = vmatprep.subr.bf16.mxu0 %v1502_v10  ;;  %796 = vmatpush2.bf16.msra.mxu1 %v1501_v12  ;;  %v1577_v10 = vld [vmem:[%s1773_s3 + $0x48] sm:$0xff]   ;;  %v1579_v12 = vld [vmem:[%s1773_s3 + $0x40] sm:$0xff]  }
  0x49   :  { %797 = vmatprep.subr.bf16.mxu1 %v1505_v15 }
  0x4b   :  { %757 = vmatpush2.bf16.msra.mxu0 %v1504_v16 }
  0x4c   :  { %808 = vmatprep.subr.bf16.mxu0 %v1516_v19  ;;  %798 = vmatpush2.bf16.msra.mxu1 %v1513_v20 }
  0x4d   :  { %863 = vmatprep.subr.bf16.mxu1 %v1561_v27  ;;  %v143_v27 = vld [vmem:[%s1772_s2] sm:$0x3] }
  0x4e   :  { %759 = vmatmul.mubr.bf16.vlgmr.msra.gmra.mxu0 %v201_v18 }
  0x4f   :  { %809 = vmatpush1.bf16.msra.mxu0 %v1514_v21  ;;  %840 = vmatprep.mubr.bf16.mxu0 %v222_v22 }
  0x50   :  { %800 = vmatmul.mubr.bf16.vlgmr.msra.gmra.mxu1 %v223_v24  ;;  %810 = vmatprep.subr.bf16.mxu0 %v1519_v25 }
  0x51   :  { %881 = vmatprep.mubr.bf16.mxu1 %v1623_v32  ;;  %864 = vmatpush1.bf16.msra.mxu1 %v1559_v26  ;;  %v147_v26 = vsub.s32 0, %v1669_v44 }
  0x52   :  { %1366 = vmatprep.subr.bf16.mxu1 %v1565_v62  ;;  %v1341_v62 = vld [vmem:[%s1774_s4] ss:$0 sm:$0xff] }
  0x53   :  { %811 = vmatpush1.bf16.msra.mxu0 %v1517_v28  ;;  %v151_v28 = vsub.s32 1, %v1669_v44 }
  0x54   :  { %812 = vmatprep.subr.bf16.mxu0 %v1522_v29  ;;  %v148_v29 = vrot.slane %v143_v27, %v147_v26 }
  0x57   :  { %813 = vmatpush1.bf16.msra.mxu0 %v1520_v31 }
  0x58   :  { %814 = vmatprep.subr.bf16.mxu0 %v1525_v33  ;;  %1340 = vmatmul.mubr.msk.bf16.vlgmr.msra.gmra.mxu1 %vm722_vm0, %v224_v34 }
  0x59   :  { %1367 = vmatpush3.bf16.msra.mxu1 %v1566_v63 }
  0x5a   :  { %1368 = vmatprep.subr.bf16.mxu1 %v1567_v0 }
  0x5b   :  { %815 = vmatpush1.bf16.msra.mxu0 %v1523_v35 }
  0x5c   :  { %816 = vmatprep.subr.bf16.mxu0 %v1528_v36 }
  0x5d   :  { %1369 = vmatpush3.bf16.msra.mxu1 %v1568_v1 }
  0x5e   :  { %1370 = vmatprep.subr.bf16.mxu1 %v1569_v2 }
  0x5f   :  { %817 = vmatpush1.bf16.msra.mxu0 %v1526_v37 }
  0x60   :  { %818 = vmatprep.subr.bf16.mxu0 %v1531_v38 }
  0x61   :  { %1371 = vmatpush3.bf16.msra.mxu1 %v1570_v3 }
  0x62   :  { %1372 = vmatprep.subr.bf16.mxu1 %v1571_v4 }
  0x63   :  { %819 = vmatpush1.bf16.msra.mxu0 %v1529_v39 }
  0x64   :  { %820 = vmatprep.subr.bf16.mxu0 %v1534_v40 }
  0x65   :  { %1373 = vmatpush3.bf16.msra.mxu1 %v1572_v5 }
  0x66   :  { %1374 = vmatprep.subr.bf16.mxu1 %v1573_v6 }
  0x67   :  { %821 = vmatpush1.bf16.msra.mxu0 %v1532_v41 }
  0x68   :  { %822 = vmatprep.subr.bf16.mxu0 %v1537_v42 }
  0x69   :  { %1375 = vmatpush3.bf16.msra.mxu1 %v1574_v7 }
  0x6a   :  { %1376 = vmatprep.subr.bf16.mxu1 %v1575_v8 }
  0x6b   :  { %823 = vmatpush1.bf16.msra.mxu0 %v1535_v43 }
  0x6c   :  { %824 = vmatprep.subr.bf16.mxu0 %v1540_v45 }
  0x6d   :  { %1377 = vmatpush3.bf16.msra.mxu1 %v1576_v9 }
  0x6e   :  { %1378 = vmatprep.subr.bf16.mxu1 %v1577_v10  ;;  %v1358_v10 = vld [vmem:[%s1776_s6] ss:$0 sm:$0xff] }
  0x6f   :  { %825 = vmatpush2.bf16.msra.mxu0 %v1538_v46 }
  0x70   :  { %826 = vmatprep.subr.bf16.mxu0 %v1543_v47 }
  0x71   :  { %1379 = vmatpush3.bf16.msra.mxu1 %v1578_v11 }
  0x72   :  { %1380 = vmatprep.subr.bf16.mxu1 %v1579_v12 }
  0x73   :  { %827 = vmatpush2.bf16.msra.mxu0 %v1541_v48 }
  0x74   :  { %828 = vmatprep.subr.bf16.mxu0 %v1546_v49 }
  0x75   :  { %1381 = vmatpush3.bf16.msra.mxu1 %v1580_v13 }
  0x77   :  { %829 = vmatpush2.bf16.msra.mxu0 %v1544_v50 }
  0x78   :  { %830 = vmatprep.subr.bf16.mxu0 %v1549_v52 }
  0x7b   :  { %831 = vmatpush2.bf16.msra.mxu0 %v1547_v53 }
  0x7c   :  { %832 = vmatprep.subr.bf16.mxu0 %v1552_v54 }
  0x7f   :  { %833 = vmatpush2.bf16.msra.mxu0 %v1550_v55 }
  0x80   :  { %834 = vmatprep.subr.bf16.mxu0 %v1555_v56  ;;  %v1581_v56 = vld [vmem:[%s1775_s5 + $0x18] sm:$0xff]  }
  0x83   :  { %835 = vmatpush2.bf16.msra.mxu0 %v1553_v57  ;;  %v1624_v57 = vmov 0.0  }
  0x84   :  { %836 = vmatprep.subr.bf16.mxu0 %v1558_v58  ;;  %1393 = vmatprep.subr.bf16.mxu1 %v1624_v57  ;;  %v1582_v58 = vld [vmem:[%s1775_s5 + $0x10] sm:$0xff]  }
  0x87   :  { %837 = vmatpush2.bf16.msra.mxu0 %v1556_v59  ;;  %v1583_v59 = vld [vmem:[%s1775_s5 + $0x8] sm:$0xff]  }
  0x88   :  { %838 = vmatprep.subr.bf16.mxu0 %v1564_v60  ;;  %v1584_v60 = vld [vmem:[%s1775_s5] sm:$0xff]  }
  0x8b   :  { %839 = vmatpush2.bf16.msra.mxu0 %v1562_v61 }
  0x8e   :  { %841 = vmatmul.mubr.bf16.vlgmr.msra.gmra.mxu0 %v208_v30  ;;  %v152_v30 = vrot.slane %v143_v27, %v151_v28 }
 0x10e   :  { %v760_v14 = vpop.f32.mrf.mxu0 }
 0x10f   :  { %v761_v31 = vadd.f32 %v760_v14, %v148_v29 }
 0x110   :  { %v762_v15 = vpop.f32.mrf.mxu0  ;;  %v801_v16 = vpop.f32.mrf.mxu1 }
 0x111   :  { %v763_v32 = vadd.f32 %v762_v15, %v152_v30  ;;  %v802_v33 = vadd.f32 %v801_v16, %v761_v31 }
 0x112   :  { %v764_v17 = vpop.f32.mrf.mxu0  ;;  %v803_v18 = vpop.f32.mrf.mxu1 }
 0x113   :  { %v804_v35 = vadd.f32 %v803_v18, %v763_v32 }
 0x114   :  { %v765_v19 = vpop.f32.mrf.mxu0  ;;  %v805_v20 = vpop.f32.mrf.mxu1 }
 0x116   :  { %v806_v21 = vpop.f32.mrf.mxu1 }
 0x118   :  { %v883_v22 = vpop.f32.mrf.mxu1 }
 0x11a   :  { %v885_v23 = vpop.f32.mrf.mxu1 }
 0x11c   :  { %v887_v24 = vpop.f32.mrf.mxu1 }
 0x11e   :  { %v888_v25 = vpop.f32.mrf.mxu1 }
 0x14e   :  { %v842_v34 = vpop.f32.mrf.mxu0 }
 0x14f   :  { %v843_v36 = vadd.f32 %v842_v34, %v802_v33 }
 0x150   :  { %v844_v37 = vpop.f32.mrf.mxu0 }
 0x151   :  { %v884_v38 = vadd.f32 %v883_v22, %v843_v36  ;;  %v845_v39 = vadd.f32 %v844_v37, %v804_v35 }
 0x152   :  { %v846_v40 = vpop.f32.mrf.mxu0 }
 0x153   :  { %v890_v41 = vsub.f32 0.0, %v884_v38  ;;  %v886_v42 = vadd.f32 %v885_v23, %v845_v39 }
 0x154   :  { %v847_v43 = vpop.f32.mrf.mxu0 }
 0x155   :  { %v892_v45 = vmul.f32 1.442695, %v890_v41  ;;  %v891_v46 = vsub.f32 0.0, %v886_v42 }
 0x157   :  { %1585 = vpow2.f32 %v892_v45  ;;  %v894_v47 = vmul.f32 1.442695, %v891_v46 }
 0x159   :  { %1587 = vpow2.f32 %v894_v47 }
 0x164   :  { %v1586_v44 = vpop.eup %1585 }
 0x165   :  { %v896_v48 = vadd.f32 1.0, %v1586_v44 }
 0x166   :  { %v1588_v49 = vpop.eup %1587 }
 0x167   :  { %v897_v50 = vadd.f32 1.0, %v1588_v49  ;;  %1589 = vrcp.f32 %v896_v48 }
 0x169   :  { %1591 = vrcp.f32 %v897_v50 }
 0x174   :  { %v1590_v52 = vpop.eup %1589 }
 0x175   :  { %v900_v55 = vpack.c.bf16 %v1590_v52, %v1590_v52 }
 0x176   :  { %v1592_v53 = vpop.eup %1591 }
 0x177   :  { %v901_v54 = vpack.c.bf16 %v1592_v53, %v1592_v53 }
 0x179   :  { %1069 = vmatprep.mubr.bf16.mxu1 %v901_v54 }
 0x17a   :  { %1070 = vmatmul.mubr.bf16.vlgmr.msra.gmra.mxu1 %v900_v55 }
 0x17b   :  { %1394 = vmatpush3.bf16.msra.mxu1 %v1581_v56  ;;  %1401 = vmatprep.mubr.msk.bf16.mxu1 %vm1625_vm1, %v1624_v57 }
 0x17c   :  { %1395 = vmatprep.subr.bf16.mxu1 %v1624_v57 }
 0x17f   :  { %1396 = vmatpush3.bf16.msra.mxu1 %v1582_v58 }
 0x180   :  { %1397 = vmatprep.subr.bf16.mxu1 %v1624_v57 }
 0x183   :  { %1398 = vmatpush3.bf16.msra.mxu1 %v1583_v59 }
 0x184   :  { %1399 = vmatprep.subr.bf16.mxu1 %v1624_v57 }
 0x187   :  { %1400 = vmatpush3.bf16.msra.mxu1 %v1584_v60 }
 0x23a   :  { %v1382_v61 = vpop.f32.mrf.mxu1 }
 0x23c   :  { %v1383_v63 = vpop.f32.mrf.mxu1 }
 0x23d   :  { %v1384_v0 = vadd.f32 %v1383_v63, %v1382_v61 }
 0x23e   :  { %v1385_v1 = vpop.f32.mrf.mxu1 }
 0x23f   :  { %v1072_v2 = vadd.f32 %v1384_v0, %v1341_v62 }
 0x240   :  { %v1386_v3 = vpop.f32.mrf.mxu1 }
 0x241   :  { %v1077_v4 = vsub.f32 0.0, %v1072_v2 }
 0x243   :  { %v1078_v5 = vmul.f32 1.442695, %v1077_v4 }
 0x245   :  { %1593 = vpow2.f32 %v1078_v5 }
 0x252   :  { %v1594_v6 = vpop.eup %1593 }
 0x253   :  { %v1080_v7 = vadd.f32 1.0, %v1594_v6 }
 0x255   :  { %1595 = vrcp.f32 %v1080_v7 }
 0x262   :  { %v1596_v8 = vpop.eup %1595 }
 0x263   :  { %v1082_v9 = vpack.c.bf16 %v1596_v8, %v1596_v8 }
 0x265   :  { %1402 = vmatmul.mubr.msk.bf16.vlgmr.msra.gmra.mxu1 %vm1122_vm2, %v1082_v9 }
 0x325   :  { %v1160_v11 = vpop.f32.mrf.mxu1 }
 0x326   :  { %v1161_v12 = vadd.f32 %v1358_v10, %v1160_v11 }
 0x327   :  { %v1403_v13 = vpop.f32.mrf.mxu1 }
 0x328   :  { %v1166_v14 = vpack.c.bf16 %v1161_v12, %v1161_v12 }
 0x329   :  { %v1163_v15 = vpop.f32.mrf.mxu1 }
 0x32a   :  { %v1174_v16 = vrot.slane %v1166_v14, %v1672_v51 }
 0x32b   :  { %v1404_v17 = vpop.f32.mrf.mxu1 }
 0x32c   :  { %1364 = vst.sshfl [vmem:[#allocation4] sm:$0x1 pattern:$0x73625140] %v1174_v16 }
 0x333   :  { %v1218_v18 = vld [vmem:[#allocation4] sm:$0x1] }
 0x334   :  { %1219 = vst [vmem:[%s1777_s7] sm:$0x1] %v1218_v18 }
 0x335   :  { %1237 = vsyncpa [#allocation3], 1 }

</bundles_post_ra>
